<compile_context>
chip_gen: v7x
topology: tpu7x:2x2x1
jax: 0.10.0
libtpu: 0.0.40
codegen_flags: <defaults>
</compile_context>

<pallas_src>
import functools

import jax
import jax.numpy as jnp
from jax import lax
from jax.experimental import pallas as pl
from jax.experimental.pallas import tpu as pltpu


def _round_up(n, m):
    return ((n + m - 1) // m) * m


def _mlp_block_kernel(*refs, apply_dropout, keep_threshold, keep_scale, eps):
    if apply_dropout:
        x_ref, w_ref, b_ref, g_ref, beta_ref, bits_ref, o_ref = refs
    else:
        x_ref, w_ref, b_ref, g_ref, beta_ref, o_ref = refs
        bits_ref = None

    # Linear (MXU, bf16 inputs / f32 accumulation) + bias.
    y = jnp.dot(x_ref[...], w_ref[...], preferred_element_type=jnp.float32)
    y = y + b_ref[...]                      # (bm, F_out) + (1, F_out)

    # ReLU (VPU).
    y = jnp.maximum(y, 0.0)

    # LayerNorm over the last axis (out_features), biased variance, eps=1e-5.
    mean = jnp.mean(y, axis=-1, keepdims=True)
    centered = y - mean
    var = jnp.mean(centered * centered, axis=-1, keepdims=True)
    y = centered * lax.rsqrt(var + eps)
    y = y * g_ref[...] + beta_ref[...]

    # Inverted dropout: compare raw uint32 bits against round(p * 2**32).
    if apply_dropout:
        keep = bits_ref[...] >= jnp.uint32(keep_threshold)
        y = jnp.where(keep, y * jnp.float32(keep_scale), jnp.float32(0.0))

    o_ref[...] = y.astype(o_ref.dtype)


def mlp_block(x, w_t, b, gamma, beta, *, dropout_p=0.3, training=True,
              rng_key=None, eps=1e-5, bm=256, matmul_dtype=jnp.bfloat16,
              out_dtype=jnp.float32):
    """Pallas MLPBlock forward.

    x:     (B, in_features) float32
    w_t:   (in_features, out_features)  -- PyTorch nn.Linear weight, transposed
    b:     (out_features,)
    gamma: (out_features,)   LayerNorm weight
    beta:  (out_features,)   LayerNorm bias
    rng_key: jax PRNG key, required when training and dropout_p > 0.
    """
    B, F_in = x.shape
    F_in_w, F_out = w_t.shape
    assert F_in_w == F_in, "weight shape mismatch"

    apply_dropout = bool(training) and float(dropout_p) > 0.0
    if apply_dropout and rng_key is None:
        raise ValueError("training with dropout requires rng_key")

    # --- Tiling: large batch tile, aligned for sublane packing. -------------
    sub = 16 if jnp.dtype(matmul_dtype).itemsize == 2 else 8
    bm_eff = max(sub, min(int(bm), _round_up(B, sub)))
    bm_eff = _round_up(bm_eff, sub)
    B_pad = _round_up(B, bm_eff)
    grid = (B_pad // bm_eff,)

    x_p = x if B_pad == B else jnp.pad(x, ((0, B_pad - B), (0, 0)))
    x_p = x_p.astype(matmul_dtype)
    w_c = w_t.astype(matmul_dtype)
    b2 = b.reshape(1, F_out).astype(jnp.float32)
    g2 = gamma.reshape(1, F_out).astype(jnp.float32)
    be2 = beta.reshape(1, F_out).astype(jnp.float32)

    in_specs = [
        pl.BlockSpec((bm_eff, F_in), lambda i: (i, 0)),    # x tile (streams)
        pl.BlockSpec((F_in, F_out), lambda i: (0, 0)),     # weight (resident)
        pl.BlockSpec((1, F_out), lambda i: (0, 0)),        # bias
        pl.BlockSpec((1, F_out), lambda i: (0, 0)),        # LN gamma
        pl.BlockSpec((1, F_out), lambda i: (0, 0)),        # LN beta
    ]
    inputs = [x_p, w_c, b2, g2, be2]

    keep_threshold = 0
    if apply_dropout:
        keep_threshold = min(int(round(float(dropout_p) * (2 ** 32))), 2 ** 32 - 1)
        bits = jax.random.bits(rng_key, (B_pad, F_out), dtype=jnp.uint32)
        in_specs.append(pl.BlockSpec((bm_eff, F_out), lambda i: (i, 0)))
        inputs.append(bits)

    kernel = functools.partial(
        _mlp_block_kernel,
        apply_dropout=apply_dropout,
        keep_threshold=keep_threshold,
        keep_scale=(1.0 / (1.0 - float(dropout_p))) if apply_dropout else 1.0,
        eps=float(eps),
    )

    # --- Explicit VMEM budget for this tiling (with headroom), <= 64 MiB. ---
    mm_bytes = jnp.dtype(matmul_dtype).itemsize
    out_bytes = jnp.dtype(out_dtype).itemsize
    est = (2 * bm_eff * F_in * mm_bytes            # x (double-buffered)
           + 2 * F_in * F_out * mm_bytes           # weight (double-buffered)
           + 2 * bm_eff * F_out * out_bytes        # output
           + 2 * 3 * F_out * 4                     # bias / gamma / beta
           + 4 * bm_eff * F_out * 4)               # f32 intermediates headroom
    if apply_dropout:
        est += 2 * bm_eff * F_out * 4              # random bits
    vmem_limit = int(min(max(2 * est, 32 * 1024 * 1024), 64 * 1024 * 1024))

    out = pl.pallas_call(
        kernel,
        out_shape=jax.ShapeDtypeStruct((B_pad, F_out), out_dtype),
        grid=grid,
        in_specs=in_specs,
        out_specs=pl.BlockSpec((bm_eff, F_out), lambda i: (i, 0)),
        compiler_params=pltpu.CompilerParams(
            dimension_semantics=("parallel",),      # batch tiles independent
            vmem_limit_bytes=vmem_limit),
    )(*inputs)

    return out[:B] if B_pad != B else out


def mlp_block_ref(x, w_t, b, gamma, beta, eps=1e-5):
    """Pure-JAX reference (eval mode / no dropout)."""
    y = jnp.maximum(x @ w_t + b, 0.0)
    mean = jnp.mean(y, axis=-1, keepdims=True)
    var = jnp.mean((y - mean) ** 2, axis=-1, keepdims=True)
    return (y - mean) * lax.rsqrt(var + eps) * gamma + beta


if __name__ == "__main__":
    key = jax.random.PRNGKey(0)
    k_x, k_w, k_b, k_drop = jax.random.split(key, 4)

    B, F_in, F_out = 16, 32, 128
    dropout_p = 0.3

    x = jax.random.normal(k_x, (B, F_in), dtype=jnp.float32)
    # nn.Linear stores weight as (out, in); the kernel takes the transpose.
    w = jax.random.normal(k_w, (F_out, F_in), dtype=jnp.float32) * (1.0 / jnp.sqrt(F_in))
    w_t = jnp.asarray(w.T)
    b = jax.random.normal(k_b, (F_out,), dtype=jnp.float32) * 0.01
    gamma = jnp.ones((F_out,), dtype=jnp.float32)
    beta = jnp.zeros((F_out,), dtype=jnp.float32)

    ref = mlp_block_ref(x, w_t, b, gamma, beta)

    # 1) Eval mode, f32 matmul -> strict check vs pure-JAX reference.
    out_f32 = jax.block_until_ready(
        mlp_block(x, w_t, b, gamma, beta, dropout_p=dropout_p, training=False,
                  matmul_dtype=jnp.float32))
    assert out_f32.shape == (B, F_out)
    assert jnp.allclose(out_f32, ref, atol=1e-4, rtol=1e-4), "f32 mismatch vs reference"

    # 2) Eval mode, bf16 matmul (perf path) -> loose check vs reference.
    out_bf16 = jax.block_until_ready(
        mlp_block(x, w_t, b, gamma, beta, dropout_p=dropout_p, training=False))
    assert jnp.allclose(out_bf16, ref, atol=1e-1, rtol=1e-1), "bf16 mismatch vs reference"

    # 3) Training mode with dropout (bf16 matmul path).
    out_train = jax.block_until_ready(
        mlp_block(x, w_t, b, gamma, beta, dropout_p=dropout_p, training=True,
                  rng_key=k_drop))
    assert out_train.shape == (B, F_out)
    zero_frac = float(jnp.mean(out_train == 0.0))
    assert 0.1 < zero_frac < 0.5, f"unexpected dropout zero fraction {zero_frac}"

    print("KERNEL_OK")
</pallas_src>

<mosaic_0001>
module attributes {stable_mosaic.version = 11 : i64} {
  func.func @_mlp_block_kernel(%arg0: i32, %arg1: memref<16x32xf32, #tpu.memory_space<vmem>>, %arg2: memref<32x128xf32, #tpu.memory_space<vmem>>, %arg3: memref<1x128xf32, #tpu.memory_space<vmem>>, %arg4: memref<1x128xf32, #tpu.memory_space<vmem>>, %arg5: memref<1x128xf32, #tpu.memory_space<vmem>>, %arg6: memref<16x128xf32, #tpu.memory_space<vmem>>) attributes {dimension_semantics = [#tpu.dimension_semantics<parallel>], iteration_bounds = array<i64: 1>, scalar_prefetch = 0 : i64, scratch_operands = 0 : i64, tpu.core_type = #tpu.core_type<tc>, window_params = [{transform_indices = @transform_0, window_bounds = array<i64: 16, 32>}, {pipeline_mode = #tpu.pipeline_mode<synchronous>, transform_indices = @transform_1, window_bounds = array<i64: 32, 128>}, {pipeline_mode = #tpu.pipeline_mode<synchronous>, transform_indices = @transform_2, window_bounds = array<i64: 1, 128>}, {pipeline_mode = #tpu.pipeline_mode<synchronous>, transform_indices = @transform_3, window_bounds = array<i64: 1, 128>}, {pipeline_mode = #tpu.pipeline_mode<synchronous>, transform_indices = @transform_4, window_bounds = array<i64: 1, 128>}, {transform_indices = @transform_5, window_bounds = array<i64: 16, 128>}]} {
    %c0 = arith.constant 0 : index
    %c0_0 = arith.constant 0 : index
    %0 = vector.load %arg1[%c0, %c0_0] : memref<16x32xf32, #tpu.memory_space<vmem>>, vector<16x32xf32>
    %c0_1 = arith.constant 0 : index
    %c0_2 = arith.constant 0 : index
    %1 = vector.load %arg2[%c0_1, %c0_2] : memref<32x128xf32, #tpu.memory_space<vmem>>, vector<32x128xf32>
    %cst = arith.constant dense<0.000000e+00> : vector<16x128xf32>
    %2 = tpu.matmul %0, %1, %cst {dimension_numbers = #tpu.dot_dimension_numbers<[1], [0], [0], [1], [0, 0, 1, 1], [], []>} : vector<16x32xf32>, vector<32x128xf32>, vector<16x128xf32> -> vector<16x128xf32>
    %c0_3 = arith.constant 0 : index
    %c0_4 = arith.constant 0 : index
    %3 = vector.load %arg3[%c0_3, %c0_4] : memref<1x128xf32, #tpu.memory_space<vmem>>, vector<1x128xf32>
    %4 = vector.broadcast %3 : vector<1x128xf32> to vector<16x128xf32>
    %5 = arith.addf %2, %4 : vector<16x128xf32>
    %cst_5 = arith.constant 0.000000e+00 : f32
    %6 = vector.broadcast %cst_5 : f32 to vector<16x128xf32>
    %7 = arith.maximumf %5, %6 : vector<16x128xf32>
    %cst_6 = arith.constant dense<0.000000e+00> : vector<16xf32>
    %8 = vector.multi_reduction <add>, %7, %cst_6 [1] : vector<16x128xf32> to vector<16xf32>
    %9 = vector.shape_cast %8 : vector<16xf32> to vector<16x1xf32>
    %cst_7 = arith.constant 1.280000e+02 : f32
    %10 = vector.broadcast %cst_7 : f32 to vector<16x1xf32>
    %11 = arith.divf %9, %10 : vector<16x1xf32>
    %12 = vector.broadcast %11 : vector<16x1xf32> to vector<16x128xf32>
    %13 = arith.subf %7, %12 : vector<16x128xf32>
    %14 = arith.mulf %13, %13 : vector<16x128xf32>
    %cst_8 = arith.constant dense<0.000000e+00> : vector<16xf32>
    %15 = vector.multi_reduction <add>, %14, %cst_8 [1] : vector<16x128xf32> to vector<16xf32>
    %16 = vector.shape_cast %15 : vector<16xf32> to vector<16x1xf32>
    %cst_9 = arith.constant 1.280000e+02 : f32
    %17 = vector.broadcast %cst_9 : f32 to vector<16x1xf32>
    %18 = arith.divf %16, %17 : vector<16x1xf32>
    %cst_10 = arith.constant 9.99999974E-6 : f32
    %19 = vector.broadcast %cst_10 : f32 to vector<16x1xf32>
    %20 = arith.addf %18, %19 : vector<16x1xf32>
    %21 = math.rsqrt %20 : vector<16x1xf32>
    %22 = vector.broadcast %21 : vector<16x1xf32> to vector<16x128xf32>
    %23 = arith.mulf %13, %22 : vector<16x128xf32>
    %c0_11 = arith.constant 0 : index
    %c0_12 = arith.constant 0 : index
    %24 = vector.load %arg4[%c0_11, %c0_12] : memref<1x128xf32, #tpu.memory_space<vmem>>, vector<1x128xf32>
    %25 = vector.broadcast %24 : vector<1x128xf32> to vector<16x128xf32>
    %26 = arith.mulf %23, %25 : vector<16x128xf32>
    %c0_13 = arith.constant 0 : index
    %c0_14 = arith.constant 0 : index
    %27 = vector.load %arg5[%c0_13, %c0_14] : memref<1x128xf32, #tpu.memory_space<vmem>>, vector<1x128xf32>
    %28 = vector.broadcast %27 : vector<1x128xf32> to vector<16x128xf32>
    %29 = arith.addf %26, %28 : vector<16x128xf32>
    %c0_15 = arith.constant 0 : index
    %c0_16 = arith.constant 0 : index
    %30 = vector.load %arg6[%c0_15, %c0_16] : memref<16x128xf32, #tpu.memory_space<vmem>>, vector<16x128xf32>
    tpu.vector_store %arg6[%c0_15, %c0_16], %29 {strides = array<i32>} : memref<16x128xf32, #tpu.memory_space<vmem>>, vector<16x128xf32>,
    return
  }
  func.func @transform_0(%arg0: i32) -> (i32, i32) {
    %c0_i32 = arith.constant 0 : i32
    %c0_i32_0 = arith.constant 0 : i32
    return %arg0, %c0_i32 : i32, i32
  }
  func.func @transform_1(%arg0: i32) -> (i32, i32) {
    %c0_i32 = arith.constant 0 : i32
    %c0_i32_0 = arith.constant 0 : i32
    %c0_i32_1 = arith.constant 0 : i32
    return %c0_i32, %c0_i32_0 : i32, i32
  }
  func.func @transform_2(%arg0: i32) -> (i32, i32) {
    %c0_i32 = arith.constant 0 : i32
    %c0_i32_0 = arith.constant 0 : i32
    %c0_i32_1 = arith.constant 0 : i32
    return %c0_i32, %c0_i32_0 : i32, i32
  }
  func.func @transform_3(%arg0: i32) -> (i32, i32) {
    %c0_i32 = arith.constant 0 : i32
    %c0_i32_0 = arith.constant 0 : i32
    %c0_i32_1 = arith.constant 0 : i32
    return %c0_i32, %c0_i32_0 : i32, i32
  }
  func.func @transform_4(%arg0: i32) -> (i32, i32) {
    %c0_i32 = arith.constant 0 : i32
    %c0_i32_0 = arith.constant 0 : i32
    %c0_i32_1 = arith.constant 0 : i32
    return %c0_i32, %c0_i32_0 : i32, i32
  }
  func.func @transform_5(%arg0: i32) -> (i32, i32) {
    %c0_i32 = arith.constant 0 : i32
    %c0_i32_0 = arith.constant 0 : i32
    return %arg0, %c0_i32 : i32, i32
  }
}

</mosaic_0001>

<bundles_post_ra>
// kernel: tpu_custom_call.1
= control target key start
LH: loop header
LB: loop body
LE: loop exit
PB: predicated region body
PF: predicated region fallthrough
CT: control target
= control target key end

     0   :  { %10 = vsyncpa [#allocation3], 0  ;;  %s407_s0 = inlined_call_operand.hbm [shape: f32[16,32], index: 0, kind: input, shape index: {}]   ;;  %s408_s1 = inlined_call_operand.hbm [shape: f32[32,128], index: 1, kind: input, shape index: {}]   ;;  %s409_s2 = inlined_call_operand.vmem [shape: f32[1,128], index: 2, kind: input, shape index: {}]   ;;  %s410_s3 = inlined_call_operand.vmem [shape: f32[1,128], index: 3, kind: input, shape index: {}]   ;;  %s411_s4 = inlined_call_operand.vmem [shape: f32[1,128], index: 4, kind: input, shape index: {}]   ;;  %s412_s5 = inlined_call_operand.hbm [shape: f32[16,128], index: 5, kind: output, shape index: {}]  }
   0x1   :  { %11 = vsyncpa [#allocation6], 0 }
   0x2   :  { %12 = vsyncpa [#allocation4], 0  ;;  %s318_s18 = smov [#allocation2]   ;;  %s246_s22 = scalar_lea.hbm %s407_s0, 256 }
   0x3   :  { %s18_s19 = sshll.u32 %s318_s18, 4  ;;  %p247_p0 = scmp.ne.s32.totalorder %s407_s0, %s246_s22  ;;  %s19_s19 = int_to_ptr.vmem [resolvable:$true] %s18_s19 }
   0x4   :  { %p250_p1 = scmp.lt.u32.totalorder %s246_s22, %s407_s0 }
   0x6   :  { %p252_p2 = pnand %p250_p1, %p247_p0 }
   0x8   :  { %255 = shalt.err (!%p252_p2)
}
   0x9   :  { %s256_s27 = scalar_lea.vmem %s19_s19, 256  ;;  %p261_p4 = scmp.lt.s32.totalorder %s19_s19, %s19_s19 }
   0xa   :  { %p257_p3 = scmp.ne.s32.totalorder %s19_s19, %s256_s27  ;;  %p262_p5 = scmp.lt.s32.totalorder %s256_s27, %s256_s27 }
   0xc   :  { %p263_p6 = por %p262_p5, %p261_p4 }
   0xe   :  { %p264_p7 = pnand %p263_p6, %p257_p3 }
  0x10   :  { %267 = shalt.err (!%p264_p7)
}
  0x11   :  { %s319_s28 = smov 128   ;;  %s320_s29 = smov 8  }
  0x12   :  { %24 = dma.hbm_to_vmem [thread:$0]  %s407_s0, 256, %s19_s19, [#allocation3], %s319_s28, %s319_s28, %s320_s29  }
  0x13   :  { %s321_s7 = smov [#allocation5]   ;;  %s268_s11 = scalar_lea.hbm %s408_s1, 512 }
  0x14   :  { %s30_s8 = sshll.u32 %s321_s7, 4  ;;  %p269_p8 = scmp.ne.s32.totalorder %s408_s1, %s268_s11  ;;  %s31_s8 = int_to_ptr.vmem [resolvable:$true] %s30_s8 }
  0x15   :  { %p272_p9 = scmp.lt.u32.totalorder %s268_s11, %s408_s1 }
  0x17   :  { %p274_p10 = pnand %p272_p9, %p269_p8 }
  0x19   :  { %277 = shalt.err (!%p274_p10)
}
  0x1a   :  { %s278_s16 = scalar_lea.vmem %s31_s8, 512  ;;  %p283_p12 = scmp.lt.s32.totalorder %s31_s8, %s31_s8 }
  0x1b   :  { %p279_p11 = scmp.ne.s32.totalorder %s31_s8, %s278_s16  ;;  %p284_p13 = scmp.lt.s32.totalorder %s278_s16, %s278_s16 }
  0x1d   :  { %p285_p0 = por %p284_p13, %p283_p12 }
  0x1f   :  { %p286_p1 = pnand %p285_p0, %p279_p11 }
  0x21   :  { %289 = shalt.err (!%p286_p1)
}
  0x22   :  { %36 = dma.hbm_to_vmem [thread:$0]  %s408_s1, 512, %s31_s8, [#allocation6], %s319_s28, %s319_s28, %s320_s29  }
  0x23   :  { %312 = dma.done.wait [#allocation3], 256  }
  0x24   :  { %313 = vsyncadd [#allocation3], 4294967040 }
  0x25   :  { %314 = dma.done.wait [#allocation6], 512  }
  0x26   :  { %315 = vsyncadd [#allocation6], 4294966784  ;;  %vm62_vm0 = vcmask 261120   ;;  %v51_v0 = vld [vmem:[#allocation5] sm:$0xff]  ;;  %v52_v1 = vld [vmem:[#allocation5 + $0x8] sm:$0xff]  ;;  %s322_s22 = smov [#allocation7]  }
  0x27   :  { %v53_v2 = vld [vmem:[#allocation5 + $0x10] sm:$0xff]  ;;  %v229_v3 = vpack.c.bf16 %v52_v1, %v51_v0  ;;  %v54_v4 = vld [vmem:[#allocation5 + $0x18] sm:$0xff]  ;;  %s194_s23 = sshll.u32 %s322_s22, 4  ;;  %s195_s23 = int_to_ptr.vmem [resolvable:$true] %s194_s23 }
  0x28   :  { %v49_v5 = vld [vmem:[#allocation2] sm:$0xff]  ;;  %v233_v6 = vpack.c.bf16 %v54_v4, %v53_v2  ;;  %v50_v7 = vld [vmem:[#allocation2 + $0x8] sm:$0xff]  ;;  %s290_s24 = scalar_lea.vmem %s195_s23, 256  ;;  %p295_p3 = scmp.lt.s32.totalorder %s195_s23, %s195_s23 }
  0x29   :  { %226 = vmatprep.mubr.msk.f32.mxu0 %vm62_vm0, %v49_v5  ;;  %230 = vmatprep.subr.bf16.mxu0 %v229_v3  ;;  %v207_v8 = vld [vmem:[%s409_s2] ss:$0 sm:$0xff]  ;;  %p291_p2 = scmp.ne.s32.totalorder %s195_s23, %s290_s24  ;;  %p296_p4 = scmp.lt.s32.totalorder %s290_s24, %s290_s24 }
  0x2a   :  { %232 = vmatpush3.bf16.msra.mxu0 %v229_v3  ;;  %v210_v30 = vld [vmem:[%s410_s3] ss:$0 sm:$0xff] }
  0x2b   :  { %234 = vmatprep.subr.bf16.mxu0 %v233_v6  ;;  %v211_v32 = vld [vmem:[%s411_s4] ss:$0 sm:$0xff]  ;;  %p297_p5 = por %p296_p4, %p295_p3 }
  0x2d   :  { %p298_p6 = pnand %p297_p5, %p291_p2 }
  0x2e   :  { %236 = vmatpush3.bf16.msra.mxu0 %v233_v6 }
  0x31   :  { %227 = vmatmul.mubr.msk.f32.vlgmr.msra.gmra.mrb[0].mxu0 %vm62_vm0, %v50_v7 }
 0x104   :  { %v228_v9 = vpop.f32.mrb[0].mxu0 }
 0x105   :  { %v135_v10 = vpop.f32.mrb[1].mxu0  ;;  %v141_v12 = vadd.f32 %v228_v9, %v207_v8 }
 0x106   :  { %v136_v11 = vadd.f32 %v207_v8, %v135_v10 }
 0x107   :  { %v145_v14 = vmax.f32 %v141_v12, 0.0 }
 0x108   :  { %v144_v13 = vmax.f32 %v136_v11, 0.0 }
 0x10a   :  { %146 = vadd.xlane.f32.xlu0 %v144_v13 }
 0x10e   :  { %148 = vadd.xlane.f32.xlu0 %v145_v14 }
 0x197   :  { %v147_v15 = vpop.xlane.xlu0 %146 }
 0x198   :  { %v151_v16 = vmul.f32 0.0078125, %v147_v15 }
 0x19a   :  { %v153_v17 = vsub.f32 %v144_v13, %v151_v16 }
 0x19b   :  { %v149_v18 = vpop.xlane.xlu0 %148 }
 0x19c   :  { %v152_v19 = vmul.f32 0.0078125, %v149_v18  ;;  %v155_v20 = vmul.f32 %v153_v17, %v153_v17 }
 0x19e   :  { %v154_v21 = vsub.f32 %v145_v14, %v152_v19  ;;  %157 = vadd.xlane.f32.xlu1 %v155_v20 }
 0x1a0   :  { %v156_v22 = vmul.f32 %v154_v21, %v154_v21 }
 0x1a2   :  { %159 = vadd.xlane.f32.xlu1 %v156_v22 }
 0x22b   :  { %v158_v23 = vpop.xlane.xlu1 %157 }
 0x22c   :  { %v161_v24 = vmul.f32 0.0078125, %v158_v23 }
 0x22e   :  { %v163_v25 = vadd.f32 1e-05, %v161_v24 }
 0x22f   :  { %v160_v26 = vpop.xlane.xlu1 %159 }
 0x230   :  { %242 = vrsqrt.f32 %v163_v25  ;;  %v162_v27 = vmul.f32 0.0078125, %v160_v26 }
 0x232   :  { %v164_v28 = vadd.f32 1e-05, %v162_v27 }
 0x234   :  { %244 = vrsqrt.f32 %v164_v28 }
 0x23a   :  { %v243_v29 = vpop.eup %242 }
 0x23b   :  { %v167_v31 = vmul.f32 %v243_v29, %v153_v17 }
 0x23d   :  { %v176_v33 = vmul.f32 %v210_v30, %v167_v31 }
 0x23e   :  { %v245_v34 = vpop.eup %244 }
 0x23f   :  { %v168_v35 = vmul.f32 %v245_v34, %v154_v21  ;;  %v185_v36 = vadd.f32 %v211_v32, %v176_v33 }
 0x241   :  { %v177_v37 = vmul.f32 %v210_v30, %v168_v35  ;;  %187 = vst [vmem:[#allocation7] sm:$0xff] %v185_v36 }
 0x243   :  { %v186_v38 = vadd.f32 %v211_v32, %v177_v37 }
 0x245   :  { %188 = vst [vmem:[#allocation7 + $0x8] sm:$0xff] %v186_v38 }
 0x246   :  { %301 = shalt.err (!%p298_p6)
}
 0x247   :  { %s302_s25 = scalar_lea.hbm %s412_s5, 256 }
 0x248   :  { %p303_p7 = scmp.ne.s32.totalorder %s412_s5, %s302_s25  ;;  %p306_p8 = scmp.lt.u32.totalorder %s302_s25, %s412_s5 }
 0x24a   :  { %p308_p9 = pnand %p306_p8, %p303_p7 }
 0x24c   :  { %311 = shalt.err (!%p308_p9)
}
 0x24d   :  { %200 = dma.vmem_to_hbm [thread:$0]  %s195_s23, 256, %s412_s5, [#allocation4], %s319_s28, %s319_s28, %s320_s29  }
 0x24e   :  { %316 = dma.done.wait [#allocation4], 256  }
 0x24f   :  { %317 = vsyncadd [#allocation4], 4294967040 }
 0x250   :  { %204 = vsyncpa [#allocation3], 1 }
 0x251   :  { %205 = vsyncpa [#allocation6], 1 }
 0x252   :  { %206 = vsyncpa [#allocation4], 1 }

</bundles_post_ra>
